<compile_context>
chip_gen: v6e
topology: v6e:2x2x1
jax: 0.10.0
libtpu: 0.0.40
codegen_flags: <defaults>
</compile_context>

<pallas_src>
import jax
import jax.numpy as jnp
from jax import lax
from jax.experimental import pallas as pl
from jax.experimental.pallas import tpu as pltpu

EPS = 1e-8  # torch.nn.functional.cosine_similarity default eps


def _mpm_kernel(w_ref, c_ref, o_ref, out_ref):
    """One (batch block, T tile) grid step.

    w_ref  : [mp, D]              perspective weights (resident across steps)
    c_ref  : [Bt, Tt, D]          this-side context tile
    o_ref  : [Bt, O, D]           other-side context (resident across T tiles)
    out_ref: [Bt, 2, mp, Tt]      [:,0]=max-pool, [:,1]=mean-pool (T on lanes)
    """
    w = w_ref[...]                                        # [mp, D]  f32
    c = c_ref[...]                                        # [Bt, Tt, D]
    o = o_ref[...]                                        # [Bt, O, D]

    mp, d = w.shape
    bt, t_len, _ = c.shape
    o_len = o.shape[1]

    w2 = w * w                                            # [mp, D]
    w2b = jnp.broadcast_to(w2[None], (bt, mp, d))         # [Bt, mp, D]

    # dot_general dim numbers: contract trailing D, batch over Bt.
    dn = (((2,), (2,)), ((0,), (0,)))

    # Squared per-perspective norms, produced directly in the [Bt, mp, .]
    # orientation the reductions need (no XLU transposes).  Kept in f32.
    na2 = lax.dot_general(w2b, c * c, dn,
                          preferred_element_type=jnp.float32)   # [Bt, mp, Tt]
    nb2 = lax.dot_general(w2b, o * o, dn,
                          preferred_element_type=jnp.float32)   # [Bt, mp, O]

    # 1 / max(||x||, eps) == rsqrt(max(||x||^2, eps^2))  (EUP, no big divide)
    inv_na = lax.rsqrt(jnp.maximum(na2, EPS * EPS))             # [Bt, mp, Tt]
    inv_nb = lax.rsqrt(jnp.maximum(nb2, EPS * EPS))             # [Bt, mp, O]

    # Fold w^2 into the (T-tiled, hence bounded) "this" side, flatten (mp, Tt)
    # and run ONE bf16 MXU matmul per batch element with f32 accumulation.
    cw = w2[None, :, None, :] * c[:, None, :, :]                # [Bt, mp, Tt, D] f32
    cw = cw.reshape(bt, mp * t_len, d).astype(jnp.bfloat16)     # pure relabel (Tt % 8 == 0)
    o_bf = o.astype(jnp.bfloat16)
    dot = lax.dot_general(cw, o_bf, dn,
                          preferred_element_type=jnp.float32)   # [Bt, mp*Tt, O]
    dot = dot.reshape(bt, mp, t_len, o_len)                     # [Bt, mp, Tt, O]

    # 1/||b|| varies with o, so it must go before the O-reduction; the positive
    # per-(p,t) scale 1/||a|| commutes with max/mean and is applied after.
    scaled = dot * inv_nb[:, :, None, :]                        # [Bt, mp, Tt, O]
    t_max = jnp.max(scaled, axis=3) * inv_na                    # [Bt, mp, Tt]
    t_mean = jnp.sum(scaled, axis=3) * (inv_na * (1.0 / o_len)) # [Bt, mp, Tt]

    # One contiguous, lane-dense store (Tt on lanes).
    out_ref[...] = jnp.stack([t_max, t_mean], axis=1).astype(out_ref.dtype)


def _round_up(x, m):
    return ((x + m - 1) // m) * m


def _vmem_limit_bytes():
    """Per-generation VMEM limit with headroom for compiler scratch/buffers."""
    try:
        cap = pltpu.get_tpu_info().vmem_capacity_bytes
    except Exception:
        cap = 64 * 1024 * 1024   # conservative fallback: v7x per-TC physical VMEM
    return int(cap * 3 // 4)


def _per_batch_elem_bytes(t_tile, o_len, d, mp):
    f32, bf16 = 4, 2
    inputs = 2 * (t_tile * d + o_len * d) * f32           # double-buffered c / o blocks
    cw = mp * t_tile * d * (f32 + bf16)                   # f32 build + bf16 cast
    o_cast = o_len * d * bf16
    big = 2 * mp * t_tile * o_len * f32                   # dot + scaled
    norms = 4 * mp * (t_tile + o_len) * f32               # na2/nb2 + rsqrt copies
    outs = 2 * (2 * mp * t_tile) * f32                    # double-buffered out block
    return inputs + cw + o_cast + big + norms + outs


def _pick_block_b(bsz, n_t, t_tile, o_len, d, mp, vmem_limit):
    """Largest block_b that fits the VMEM budget, keeps >=2 batch grid steps
    (v7x dual-TensorCore sharding) and prefers >=4 total grid steps."""
    budget = int(vmem_limit * 0.6)          # leave room for weight & misc scratch
    per_b = _per_batch_elem_bytes(t_tile, o_len, d, mp)
    cap = bsz // 2 if bsz >= 2 else 1
    cap = max(1, min(cap, 8))
    feasible = [x for x in range(1, cap + 1)
                if bsz % x == 0 and x * per_b <= budget]
    if not feasible:
        return 1
    good = [x for x in feasible if (bsz // x) * n_t >= 4]
    return max(good) if good else max(feasible)


def maxpool_match_lay(weight, cont_repres, other_cont_repres, *,
                      block_b=None, t_tile=None):
    """Pallas implementation of MaxpoolMatchLay.forward.

    Args:
      weight:             [mp_dim, cont_dim]
      cont_repres:        [bsz, this_len, cont_dim]
      other_cont_repres:  [bsz, other_len, cont_dim]
    Returns:
      [bsz, this_len, 2*mp_dim] = concat(max-pool, mean-pool) of cosine sims.
    """
    bsz, this_len, d = cont_repres.shape
    _, other_len, _ = other_cont_repres.shape
    mp = weight.shape[0]

    # ---- T tiling / padding (keeps in-kernel reshapes pure relabels) ----
    if t_tile is None:
        t_tile = 128 if this_len > 128 else _round_up(this_len, 8)
    t_tile = max(8, _round_up(t_tile, 8))
    padded_t = _round_up(this_len, t_tile)
    if padded_t != this_len:
        cont_repres = jnp.pad(
            cont_repres, ((0, 0), (0, padded_t - this_len), (0, 0)))
    n_t = padded_t // t_tile

    vmem_limit = _vmem_limit_bytes()
    if block_b is None:
        block_b = _pick_block_b(bsz, n_t, t_tile, other_len, d, mp, vmem_limit)
    assert bsz % block_b == 0, (bsz, block_b)

    grid = (bsz // block_b, n_t)   # T tile innermost -> `other` block stays resident

    out = pl.pallas_call(
        _mpm_kernel,
        out_shape=jax.ShapeDtypeStruct((bsz, 2, mp, padded_t),
                                       cont_repres.dtype),
        grid=grid,
        in_specs=[
            pl.BlockSpec((mp, d), lambda b, t: (0, 0)),                   # weight
            pl.BlockSpec((block_b, t_tile, d), lambda b, t: (b, t, 0)),   # this side
            pl.BlockSpec((block_b, other_len, d), lambda b, t: (b, 0, 0)),
        ],
        out_specs=pl.BlockSpec((block_b, 2, mp, t_tile),
                               lambda b, t: (b, 0, 0, t)),
        compiler_params=pltpu.CompilerParams(
            dimension_semantics=("parallel", "parallel"),
            vmem_limit_bytes=vmem_limit),
    )(weight, cont_repres, other_cont_repres)

    out = out[:, :, :, :this_len]              # drop T padding
    out = jnp.transpose(out, (0, 3, 1, 2))     # [B, T, 2, mp]
    return out.reshape(bsz, this_len, 2 * mp)  # cat(max, mean) along last dim


def _reference(weight, cont, other):
    """Pure-JAX reference mirroring the PyTorch forward (f32 throughout)."""
    a = cont[:, :, None, :] * weight[None, None, :, :]      # [B, T, mp, D]
    b = other[:, :, None, :] * weight[None, None, :, :]     # [B, O, mp, D]
    a = a[:, :, None, :, :]                                  # [B, T, 1, mp, D]
    b = b[:, None, :, :, :]                                  # [B, 1, O, mp, D]
    dot = jnp.sum(a * b, axis=-1)
    na = jnp.sqrt(jnp.sum(a * a, axis=-1))
    nb = jnp.sqrt(jnp.sum(b * b, axis=-1))
    cos = dot / (jnp.maximum(na, EPS) * jnp.maximum(nb, EPS))    # [B, T, O, mp]
    t_max = jnp.max(cos, axis=2)
    t_mean = jnp.mean(cos, axis=2)
    return jnp.concatenate([t_max, t_mean], axis=2)


if __name__ == "__main__":
    key = jax.random.PRNGKey(0)

    def run_case(bsz, this_len, other_len, cont_dim, mp_dim, k):
        k_w, k_c, k_o = jax.random.split(k, 3)
        # weight ~ Uniform(-1, 1), matching weight.data.uniform_(-1.0, 1.0)
        weight = jax.random.uniform(k_w, (mp_dim, cont_dim), dtype=jnp.float32,
                                    minval=-1.0, maxval=1.0)
        cont = jax.random.normal(k_c, (bsz, this_len, cont_dim), jnp.float32)
        other = jax.random.normal(k_o, (bsz, other_len, cont_dim), jnp.float32)

        out = jax.block_until_ready(maxpool_match_lay(weight, cont, other))
        ref = _reference(weight, cont, other)
        assert out.shape == (bsz, this_len, 2 * mp_dim), out.shape
        # bf16 matmul operands (f32 accumulation) => ~1e-3 level deviation.
        err = jnp.max(jnp.abs(out - ref))
        assert jnp.allclose(out, ref, atol=3e-2, rtol=3e-2), \
            f"max abs diff {err}"

    # Small shapes consistent with the module's forward.
    run_case(2, 8, 8, 32, 4, jax.random.fold_in(key, 0))
    # Exercises T-tiling (this_len > 128), T padding, and block_b selection.
    run_case(2, 136, 24, 48, 6, jax.random.fold_in(key, 1))

    print("KERNEL_OK")
</pallas_src>

<mosaic_0001>
module attributes {stable_mosaic.version = 11 : i64} {
  func.func @_mpm_kernel(%arg0: i32, %arg1: i32, %arg2: memref<4x32xf32, #tpu.memory_space<vmem>>, %arg3: memref<1x8x32xf32, #tpu.memory_space<vmem>>, %arg4: memref<1x8x32xf32, #tpu.memory_space<vmem>>, %arg5: memref<1x2x4x8xf32, #tpu.memory_space<vmem>>) attributes {dimension_semantics = [#tpu.dimension_semantics<parallel>, #tpu.dimension_semantics<parallel>], iteration_bounds = array<i64: 2, 1>, scalar_prefetch = 0 : i64, scratch_operands = 0 : i64, tpu.core_type = #tpu.core_type<tc>, window_params = [{pipeline_mode = #tpu.pipeline_mode<synchronous>, transform_indices = @transform_0, window_bounds = array<i64: 4, 32>}, {transform_indices = @transform_1, window_bounds = array<i64: 1, 8, 32>}, {transform_indices = @transform_2, window_bounds = array<i64: 1, 8, 32>}, {transform_indices = @transform_3, window_bounds = array<i64: 1, 2, 4, 8>}]} {
    %c0 = arith.constant 0 : index
    %c0_0 = arith.constant 0 : index
    %0 = vector.load %arg2[%c0, %c0_0] : memref<4x32xf32, #tpu.memory_space<vmem>>, vector<4x32xf32>
    %c0_1 = arith.constant 0 : index
    %c0_2 = arith.constant 0 : index
    %c0_3 = arith.constant 0 : index
    %1 = vector.load %arg3[%c0_1, %c0_2, %c0_3] : memref<1x8x32xf32, #tpu.memory_space<vmem>>, vector<1x8x32xf32>
    %c0_4 = arith.constant 0 : index
    %c0_5 = arith.constant 0 : index
    %c0_6 = arith.constant 0 : index
    %2 = vector.load %arg4[%c0_4, %c0_5, %c0_6] : memref<1x8x32xf32, #tpu.memory_space<vmem>>, vector<1x8x32xf32>
    %3 = arith.mulf %0, %0 : vector<4x32xf32>
    %4 = vector.shape_cast %3 : vector<4x32xf32> to vector<1x4x32xf32>
    %5 = arith.mulf %1, %1 : vector<1x8x32xf32>
    %cst = arith.constant dense<0.000000e+00> : vector<1x4x8xf32>
    %6 = tpu.matmul %4, %5, %cst {dimension_numbers = #tpu.dot_dimension_numbers<[2], [2], [1], [1], [0, 0, 0, 1, 1, 1], [0], [0]>} : vector<1x4x32xf32>, vector<1x8x32xf32>, vector<1x4x8xf32> -> vector<1x4x8xf32>
    %7 = arith.mulf %2, %2 : vector<1x8x32xf32>
    %cst_7 = arith.constant dense<0.000000e+00> : vector<1x4x8xf32>
    %8 = tpu.matmul %4, %7, %cst_7 {dimension_numbers = #tpu.dot_dimension_numbers<[2], [2], [1], [1], [0, 0, 0, 1, 1, 1], [0], [0]>} : vector<1x4x32xf32>, vector<1x8x32xf32>, vector<1x4x8xf32> -> vector<1x4x8xf32>
    %cst_8 = arith.constant 1.000000e-16 : f32
    %9 = vector.broadcast %cst_8 : f32 to vector<1x4x8xf32>
    %10 = arith.maximumf %6, %9 : vector<1x4x8xf32>
    %11 = math.rsqrt %10 : vector<1x4x8xf32>
    %cst_9 = arith.constant 1.000000e-16 : f32
    %12 = vector.broadcast %cst_9 : f32 to vector<1x4x8xf32>
    %13 = arith.maximumf %8, %12 : vector<1x4x8xf32>
    %14 = math.rsqrt %13 : vector<1x4x8xf32>
    %15 = vector.shape_cast %3 : vector<4x32xf32> to vector<1x4x1x32xf32>
    %16 = vector.shape_cast %1 : vector<1x8x32xf32> to vector<1x1x8x32xf32>
    %17 = vector.broadcast %15 : vector<1x4x1x32xf32> to vector<1x4x8x32xf32>
    %18 = vector.broadcast %16 : vector<1x1x8x32xf32> to vector<1x4x8x32xf32>
    %19 = arith.mulf %17, %18 : vector<1x4x8x32xf32>
    %20 = vector.shape_cast %19 : vector<1x4x8x32xf32> to vector<1x32x32xf32>
    %21 = arith.truncf %20 : vector<1x32x32xf32> to vector<1x32x32xbf16>
    %22 = arith.truncf %2 : vector<1x8x32xf32> to vector<1x8x32xbf16>
    %cst_10 = arith.constant dense<0.000000e+00> : vector<1x32x8xf32>
    %23 = tpu.matmul %21, %22, %cst_10 {dimension_numbers = #tpu.dot_dimension_numbers<[2], [2], [1], [1], [0, 0, 0, 1, 1, 1], [0], [0]>} : vector<1x32x32xbf16>, vector<1x8x32xbf16>, vector<1x32x8xf32> -> vector<1x32x8xf32>
    %24 = vector.shape_cast %23 : vector<1x32x8xf32> to vector<1x4x8x8xf32>
    %25 = vector.shape_cast %14 : vector<1x4x8xf32> to vector<1x4x1x8xf32>
    %26 = vector.broadcast %25 : vector<1x4x1x8xf32> to vector<1x4x8x8xf32>
    %27 = arith.mulf %24, %26 : vector<1x4x8x8xf32>
    %cst_11 = arith.constant dense<0xFF800000> : vector<1x4x8xf32>
    %28 = vector.multi_reduction <maximumf>, %27, %cst_11 [3] : vector<1x4x8x8xf32> to vector<1x4x8xf32>
    %29 = arith.mulf %28, %11 : vector<1x4x8xf32>
    %cst_12 = arith.constant dense<0.000000e+00> : vector<1x4x8xf32>
    %30 = vector.multi_reduction <add>, %27, %cst_12 [3] : vector<1x4x8x8xf32> to vector<1x4x8xf32>
    %cst_13 = arith.constant 1.250000e-01 : f32
    %31 = vector.broadcast %cst_13 : f32 to vector<1x4x8xf32>
    %32 = arith.mulf %11, %31 : vector<1x4x8xf32>
    %33 = arith.mulf %30, %32 : vector<1x4x8xf32>
    %34 = vector.shape_cast %29 : vector<1x4x8xf32> to vector<1x1x4x8xf32>
    %35 = vector.shape_cast %33 : vector<1x4x8xf32> to vector<1x1x4x8xf32>
    %36 = tpu.concatenate %34, %35 in 1 : vector<1x1x4x8xf32>, vector<1x1x4x8xf32> -> vector<1x2x4x8xf32>
    %c0_14 = arith.constant 0 : index
    %c0_15 = arith.constant 0 : index
    %c0_16 = arith.constant 0 : index
    %c0_17 = arith.constant 0 : index
    %37 = vector.load %arg5[%c0_14, %c0_15, %c0_16, %c0_17] : memref<1x2x4x8xf32, #tpu.memory_space<vmem>>, vector<1x2x4x8xf32>
    tpu.vector_store %arg5[%c0_14, %c0_15, %c0_16, %c0_17], %36 {strides = array<i32>} : memref<1x2x4x8xf32, #tpu.memory_space<vmem>>, vector<1x2x4x8xf32>,
    return
  }
  func.func @transform_0(%arg0: i32, %arg1: i32) -> (i32, i32) {
    %c0_i32 = arith.constant 0 : i32
    %c0_i32_0 = arith.constant 0 : i32
    %c0_i32_1 = arith.constant 0 : i32
    return %c0_i32, %c0_i32_0 : i32, i32
  }
  func.func @transform_1(%arg0: i32, %arg1: i32) -> (i32, i32, i32) {
    %c0_i32 = arith.constant 0 : i32
    %c0_i32_0 = arith.constant 0 : i32
    return %arg0, %arg1, %c0_i32 : i32, i32, i32
  }
  func.func @transform_2(%arg0: i32, %arg1: i32) -> (i32, i32, i32) {
    %c0_i32 = arith.constant 0 : i32
    %c0_i32_0 = arith.constant 0 : i32
    %c0_i32_1 = arith.constant 0 : i32
    return %arg0, %c0_i32, %c0_i32_0 : i32, i32, i32
  }
  func.func @transform_3(%arg0: i32, %arg1: i32) -> (i32, i32, i32, i32) {
    %c0_i32 = arith.constant 0 : i32
    %c0_i32_0 = arith.constant 0 : i32
    %c0_i32_1 = arith.constant 0 : i32
    return %arg0, %c0_i32, %c0_i32_0, %arg1 : i32, i32, i32, i32
  }
}

</mosaic_0001>

<bundles_post_ra>
// kernel: tpu_custom_call.1
= control target key start
LH: loop header
LB: loop body
LE: loop exit
PB: predicated region body
PF: predicated region fallthrough
CT: control target
= control target key end

     0   :  { %8 = vsyncpa [#allocation3], 0  ;;  %s1474_s0 = inlined_call_operand.hbm [shape: f32[4,32], index: 0, kind: input, shape index: {}]   ;;  %s1475_s1 = inlined_call_operand.hbm [shape: f32[2,8,32], index: 1, kind: input, shape index: {}]   ;;  %s1476_s2 = inlined_call_operand.hbm [shape: f32[2,8,32], index: 2, kind: input, shape index: {}]   ;;  %s1477_s3 = inlined_call_operand.hbm [shape: f32[2,2,4,8], index: 3, kind: output, shape index: {}]  }
   0x1   :  { %9 = vsyncpa [#allocation6], 0 }
   0x2   :  { %11 = vsyncpa [#allocation6 + $0x1], 0 }
   0x3   :  { %12 = vsyncpa [#allocation4], 0 }
   0x4   :  { %14 = vsyncpa [#allocation4 + $0x1], 0  ;;  %s1218_s12 = smov 0   ;;  %s1220_s13 = smov 0  }
   0x5   :  { %s1222_s14 = smov 0   ;;  %s1224_s15 = smov 0  }
   0x6   :  { %s1226_s16 = smov 0   ;;  %s1228_s17 = smov 0  }
   0x7 LB: > { %s32_s18 = sadd.s32 1, %s1182_s16  ;;  %s62_s19 = sadd.s32 1, %s1174_s14  ;;  %s1186_s17 = sphi %s1228_s17, %s20_s17   ;;  %s1182_s16 = sphi %s1226_s16, %s1498_s16   ;;  %s1178_s15 = sphi %s1224_s15, %s1497_s15   ;;  %s1174_s14 = sphi %s1222_s14, %s1496_s14   ;;  %s1170_s13 = sphi %s1220_s13, %s1495_s13   ;;  %s1166_s12 = sphi %s1218_s12, %s1494_s12  }
   0x8   : > { %p34_p0 = scmp.ge.s32.totalorder %s32_s18, 2  ;;  %p69_p1 = scmp.ne.s32.totalorder %s1174_s14, %s1170_s13 }
   0x9   : > { %p70_p2 = scmp.eq.s32.totalorder %s1186_s17, 0  ;;  %p956_p5 = scmp.lt.s32.totalorder %s1186_s17, 2 }
   0xa   : > { %s1500_s18 = smov (%p34_p0, %s32_s18), 0  ;;  %s164_s21 = sand.u32 1, %s1186_s17  }
   0xb   : > { %p71_p4 = por %p70_p2, %p69_p1  ;;  %s57_s20 = ssub.s32 %s1182_s16, %s1500_s18 }
   0xc   : > { %p60_p6 = scmp.eq.s32.totalorder %s57_s20, 0  ;;  %s166_s22 = sand.u32 1, %s1174_s14  }
   0xd   : > { %s886_s23 = sshll.u32 %s1182_s16, 7  ;;  %s1268_s25 = sshll.u32 %s166_s22, 3 }
   0xe   : > { %s1266_s24 = scalar_select %p60_p6, %s1174_s14, %s62_s19  }
   0xf   : > { %s174_s28 = scalar_lea.hbm %s1475_s1, %s886_s23  ;;  %p1275_p7 = pnand %p956_p5, %p71_p4 }
  0x10   : > { %s168_s30 = scalar_lea.vmem [#allocation5], %s1268_s25  ;;  %s1280_s5 = scalar_lea.sflag [#allocation6], %s164_s21 }
  0x11   : > { %s176_s4 = sshll.u32 %s168_s30, 4  ;;  %p1022_p8 = pneg %p1275_p7  ;;  %s177_s4 = int_to_ptr.vmem [resolvable:$true] %s176_s4 }
  0x12   : > { %s1033_s6 = scalar_lea.vmem %s177_s4, 128  ;;  %s1188_s7 = smov [#allocation5]  }
  0x13   : > { %p1034_p9 = scmp.ne.s32.totalorder %s177_s4, %s1033_s6  ;;  %s1038_s8 = sshll.u32 %s1188_s7, 4  ;;  %s1039_s8 = int_to_ptr.vmem [resolvable:$false] %s1038_s8 }
  0x14   : > { %s1040_s9 = scalar_lea.vmem %s1039_s8, 256  ;;  %p1041_p12 = scmp.lt.s32.totalorder %s177_s4, %s1039_s8 }
  0x15   : > { %p1036_p10 = pnand %p1034_p9, %p1022_p8  ;;  %p1042_p13 = scmp.lt.s32.totalorder %s1040_s9, %s1033_s6 }
  0x17   : > { %p1037_p11 = pneg %p1036_p10  ;;  %p1043_p0 = por %p1042_p13, %p1041_p12 }
  0x19   : > { %p1044_p2 = pnand %p1043_p0, %p1037_p11 }
  0x1b   : > { %1047 = shalt.err (!%p1044_p2)
}
  0x1c   : > { %947 = dma.hbm_to_vmem [thread:$0]  (!%p1275_p7), %s174_s28, 128, %s177_s4, %s1280_s5  }
  0x1d   : > { %s1291_s10 = sadd.s32 4294967295, %s1186_s17   ;;  %s881_s11 = sadd.s32 4294967294, %s1186_s17  }
  0x1e   : > { %p75_p4 = scmp.ne.s32.totalorder %s1170_s13, %s1166_s12  ;;  %p1478_p5 = scmp.eq.s32.totalorder %s1291_s10, 0 }
  0x1f   : > { %p127_p6 = scmp.eq.s32.totalorder %s1291_s10, 1  ;;  %p133_p9 = scmp.eq.s32.totalorder %s881_s11, 1 }
  0x20   : > { %p882_p10 = scmp.ge.s32.totalorder %s1186_s17, 1  ;;  %p1301_p11 = por %p1478_p5, %p75_p4 }
  0x21   : > { %p1308_p12 = por %p127_p6, %p69_p1  ;;  %p1312_p13 = por %p133_p9, %p75_p4 }
  0x22   : > { %s1482_s19 = scalar_select %p1301_p11, 1, 0 }
  0x23   : > { %s1483_s20 = scalar_select %p1308_p12, 1, 0 }
  0x24   : > { %s1484_s21 = scalar_select %p1312_p13, 1, 0 }
  0x25   : > { %p140_p0 = scmp.lt.s32.totalorder %s1186_s17, 3  ;;  %s192_s27 = scalar_lea.hbm %s1476_s2, %s886_s23 }
  0x26   : > { %s1189_s30 = smov [#allocation2]   ;;  %s187_s6 = scalar_lea.vmem [#allocation7], %s1268_s25 }
  0x27   : > { %p1322_p2 = pnand %p882_p10, %p140_p0  ;;  %s153_s4 = sshll.u32 %s1189_s30, 4  ;;  %s154_s4 = int_to_ptr.vmem [resolvable:$true] %s153_s4 }
  0x28   : > { %s194_s7 = sshll.u32 %s187_s6, 4  ;;  %s1190_s9 = smov [#allocation7]   ;;  %s195_s7 = int_to_ptr.vmem [resolvable:$true] %s194_s7 }
  0x29   : > { %s1061_s8 = scalar_lea.vmem %s195_s7, 128  ;;  %s1066_s23 = sshll.u32 %s1190_s9, 4  ;;  %s1067_s23 = int_to_ptr.vmem [resolvable:$false] %s1066_s23 }
  0x2a   : > { %p1062_p4 = scmp.ne.s32.totalorder %s195_s7, %s1061_s8  ;;  %s1068_s11 = scalar_lea.vmem %s1067_s23, 256 }
  0x2b   : > { %p1069_p10 = scmp.lt.s32.totalorder %s195_s7, %s1067_s23  ;;  %p1070_p0 = scmp.lt.s32.totalorder %s1068_s11, %s1061_s8 }
  0x2c   : > { %p1064_p6 = pnand %p1062_p4, %p1022_p8 }
  0x2d   : > { %p1071_p3 = por %p1070_p0, %p1069_p10 }
  0x2e   : > { %p1065_p9 = pneg %p1064_p6 }
  0x30   : > { %p1072_p5 = pnand %p1071_p3, %p1065_p9 }
  0x32   : > { %1075 = shalt.err (!%p1072_p5)
}
  0x33   : > { %950 = dma.hbm_to_vmem [thread:$0]  (!%p1275_p7), %s192_s27, 128, %s195_s7, %s1280_s5  }
  0x34   : > { %p1486_p1 = scmp.eq.s32.totalorder %s1291_s10, 0  ;;  %p1487_p8 = pneg %p1322_p2 }
  0x35   : > { %s1087_s25 = scalar_lea.vmem %s154_s4, 64  ;;  %p1095_p0 = scmp.lt.s32.totalorder %s154_s4, %s154_s4 }
  0x36   : > { %p941_p4 = pnand %p1487_p8, %p1486_p1  ;;  %p1088_p13 = scmp.ne.s32.totalorder %s154_s4, %s1087_s25 }
  0x37   : > { %p1096_p10 = scmp.lt.s32.totalorder %s1087_s25, %s1087_s25 }
  0x38   : > { %p1078_p6 = pneg %p941_p4 }
  0x39   : > { %p1097_p3 = por %p1096_p10, %p1095_p0 }
  0x3a   : > { %p1090_p12 = pnand %p1088_p13, %p1078_p6 }
  0x3c   : > { %p1091_p11 = pneg %p1090_p12 }
  0x3e   : > { %p1098_p5 = pnand %p1097_p3, %p1091_p11 }
  0x40   : > { %1101 = shalt.err (!%p1098_p5)
}
  0x41   : > { %943 = dma.hbm_to_vmem [thread:$0]  (!%p941_p4), %s1474_s0, 64, %s154_s4, [#allocation3]  }
  0x42   : > { %203 = sbr.rel (%p1322_p2) target bundleno = 639 (0x27f), region = 32  ;;  %p1488_p7 = scmp.eq.s32.totalorder (!%p1322_p2), %s1291_s10, 0 }
  0x47   : > { %1153 = dma.done.wait (%p1488_p7), [#allocation3], 64   ;;  %p1489_p1 = pmov %p1488_p7 }
  0x48   : > { %s209_s5 = sand.u32 1, %s1291_s10   ;;  %s211_s26 = sand.u32 1, %s1170_s13  }
  0x49   : > { %1155 = vsyncadd (%p1489_p1), [#allocation3], 4294967232  ;;  %s1353_s27 = sshll.u32 %s211_s26, 3  ;;  %s210_s30 = scalar_lea.sflag [#allocation6], %s209_s5 }
  0x4a   : > { %s213_s4 = scalar_lea.vmem [#allocation5], %s1353_s27  ;;  %p1490_p11 = scmp.ne.s32.totalorder %s1482_s19, 0 }
  0x4c   : > { %1157 = dma.done.wait (%p1490_p11), %s210_s30, 256  }
  0x4d   : > { %1159 = vsyncadd (%p1490_p11), %s210_s30, 4294967040  ;;  %v414_v0 = vlaneseq  ;;  %v1191_v1 = vmov 0.0   ;;  %vm1192_vm0 = vmmov 0   ;;  %v1193_v2 = vmov 1966171168   ;;  %v252_v7 = vld [vmem:[%s213_s4] sm:$0xff] }
  0x4e   : > { %913 = vmatprep.subr.mxu1 %v1191_v1  ;;  %915 = vmatprep.mubr.msk.f32.mxu1 %vm1192_vm0, %v1191_v1  ;;  %v412_v3 = vunpack.c.l.s4 %v1193_v2  ;;  %vm256_vm1 = vcmask 261120   ;;  %v251_v8 = vld [vmem:[#allocation2] sm:$0xf]  ;;  %s222_s10 = scalar_lea.vmem [#allocation7], %s1353_s27  ;;  %v255_v10 = vmul.f32 %v252_v7, %v252_v7  ;;  %vm569_vm2 = vcmask 64512   ;;  %s249_s19 = scalar_lea.vmem [#allocation8], %s1353_s27 }
  0x4f   : > { %v1362_v4 = vshrl.u32 %v414_v0, 7  ;;  %v253_v9 = vld [vmem:[%s222_s10] sm:$0xff]  ;;  %v254_v11 = vmul.f32 %v251_v8, %v251_v8  ;;  %vm735_vm3 = vcmask 1041409   ;;  %vm737_vm4 = vcmask 1042434   ;;  %s764_s28 = sshll.u32 %s249_s19, 4  ;;  %s905_s6 = sshll.u32 %s1178_s15, 7  ;;  %s1421_s28 = int_to_ptr.vmem [resolvable:$true] %s764_s28 }
  0x50   : > { %v413_v5 = vunpack.c.0.s8 %v412_v3  ;;  %v461_v12 = vpack.c.bf16 %v253_v9, %v253_v9  ;;  %914 = vmatpush3.xpose.msk.msra.mxu1 %vm256_vm1, %v255_v10  ;;  %v333_v13 = vmul.f32 %v253_v9, %v253_v9  ;;  %v1194_v9 = vmov 0   ;;  %s1419_s9 = scalar_lea.hbm %s1477_s3, %s905_s6  ;;  %s1428_s15 = scalar_lea.sflag [#allocation4], %s211_s26 }
  0x51   : > { %v1373_v16 = vsub.s32 0, %v1362_v4  ;;  %918 = vmatprep.subr.mxu1 %v1191_v1  ;;  %v592_v37 = vsub.s32 1, %v1362_v4  ;;  %v599_v43 = vsub.s32 2, %v1362_v4  ;;  %1014 = vset.pattern.permute.xlu0 %v1194_v9  ;;  %vm739_vm5 = vcmask 1043459   ;;  %s1102_s23 = scalar_lea.vmem %s1421_s28, 128  ;;  %p1491_p13 = scmp.ne.s32.totalorder %s1483_s20, 0 }
  0x52   : > { %v1365_v6 = vsub.s32 %v413_v5, %v1362_v4  ;;  %929 = vmatprep.subr.msk.bf16.mxu0 %vm256_vm1, %v461_v12  ;;  %v469_v14 = vsel %vm256_vm1, %v461_v12, 0  ;;  %1015 = vset.pattern.permute.xlu1 %v1194_v9  ;;  %vm746_vm6 = vcmask 60416   ;;  %p1103_p12 = scmp.ne.s32.totalorder %s1421_s28, %s1102_s23  ;;  %s1195_s11 = smov [#allocation8]  }
  0x53   : > { %924 = vmatpush3.bf16.xpose.msra.mxu0 %v469_v14  ;;  %916 = vmatmul.mubr.msk.f32.vlgmr.msra.gmra.mxu1 %vm256_vm1, %v254_v11  ;;  %v606_v14 = vsub.s32 3, %v1362_v4  ;;  %s1106_s25 = sshll.u32 %s1195_s11, 4  ;;  %s1107_s25 = int_to_ptr.vmem [resolvable:$false] %s1106_s25 }
  0x54   : > { %v417_v15 = vrot.slane %v254_v11, %v1365_v6  ;;  %919 = vmatpush3.xpose.msk.msra.mxu1 %vm256_vm1, %v333_v13  ;;  %920 = vmatprep.mubr.msk.f32.mxu1 %vm1192_vm0, %v1191_v1  ;;  %p1104_p2 = pnand %p1103_p12, %p1491_p13  ;;  %s1108_s29 = scalar_lea.vmem %s1107_s25, 256 }
  0x55   : > { %p1109_p8 = scmp.lt.s32.totalorder %s1421_s28, %s1107_s25  ;;  %p1110_p4 = scmp.lt.s32.totalorder %s1108_s29, %s1102_s23 }
  0x56   : > { %v418_v17 = vcombine.high %v417_v15, %v417_v15  ;;  %v425_v18 = vrot.slane %v417_v15, %v1365_v6  ;;  %p1105_p9 = pneg %p1104_p2 }
  0x57   : > { %921 = vmatmul.mubr.msk.f32.vlgmr.msra.gmra.mxu1 %vm256_vm1, %v254_v11  ;;  %p1111_p6 = por %p1110_p4, %p1109_p8 }
  0x58   : > { %v432_v19 = vrot.slane %v418_v17, %v1365_v6  ;;  %v433_v20 = vcombine.high %v425_v18, %v425_v18  ;;  %v438_v21 = vrot.slane %v425_v18, %v1373_v16 }
  0x59   : > { %p1112_p0 = pnand %p1111_p6, %p1105_p9 }
  0x5a   : > { %v434_v22 = vcombine.high %v432_v19, %v432_v19  ;;  %v442_v23 = vrot.slane %v432_v19, %v1373_v16  ;;  %v455_v24 = vmul.f32 %v438_v21, %v252_v7  ;;  %v446_v25 = vrot.slane %v433_v20, %v1373_v16 }
  0x5c   : > { %v456_v26 = vmul.f32 %v442_v23, %v252_v7  ;;  %v450_v27 = vrot.slane %v434_v22, %v1373_v16  ;;  %v457_v28 = vmul.f32 %v446_v25, %v252_v7 }
  0x5e   : > { %v459_v29 = vpack.c.bf16 %v456_v26, %v455_v24  ;;  %v458_v30 = vmul.f32 %v450_v27, %v252_v7 }
  0x60   : > { %925 = vmatprep.mubr.msk.bf16.mxu0 %vm256_vm1, %v459_v29  ;;  %v460_v31 = vpack.c.bf16 %v458_v30, %v457_v28 }
  0x62   : > { %926 = vmatmul.mubr.msk.bf16.vlgmr.msra.gmra.mxu0 %vm256_vm1, %v460_v31 }
 0x113   : > { %v329_v32 = vpop.f32.mrf.mxu1 }
 0x114   : > { %v407_v33 = vmax.f32 %v329_v32, 1e-16 }
 0x115   : > { %v917_v34 = vpop.f32.mrf.mxu1 }
 0x116   : > { %1016 = vrsqrt.f32 %v407_v33 }
 0x117   : > { %v403_v35 = vpop.f32.mrf.mxu1 }
 0x118   : > { %v409_v38 = vmax.f32 %v403_v35, 1e-16 }
 0x119   : > { %v922_v36 = vpop.f32.mrf.mxu1 }
 0x11a   : > { %1018 = vrsqrt.f32 %v409_v38 }
 0x122   : > { %v927_v50 = vpop.f32.mrf.mxu0 }
 0x123   : > { %v1017_v39 = vpop.eup %1016 }
 0x124   : > { %v593_v40 = vrot.slane %v1017_v39, %v592_v37  ;;  %v586_v41 = vrot.slane %v1017_v39, %v1373_v16  ;;  %v631_v42 = vmul.f32 0.125, %v1017_v39  ;;  %v600_v45 = vrot.slane %v1017_v39, %v599_v43  ;;  %v505_v53 = vpop.f32.mrf.mxu0 }
 0x125   : > { %v607_v15 = vrot.slane %v1017_v39, %v606_v14 }
 0x126   : > { %595 = vbcast.lane.b32.xlu1 %v593_v40, 256  ;;  %588 = vbcast.lane.b32.xlu0 %v586_v41, 256  ;;  %v636_v44 = vrot.slane %v631_v42, %v1373_v16  ;;  %v643_v46 = vrot.slane %v631_v42, %v592_v37  ;;  %v650_v47 = vrot.slane %v631_v42, %v599_v43  ;;  %v928_v56 = vpop.f32.mrf.mxu0  ;;  %v702_v43 = vand.u32 127, %v414_v0 }
 0x127   : > { %v1019_v48 = vpop.eup %1018 }
 0x128   : > { %v527_v49 = vrot.slane %v1019_v48, %v1365_v6  ;;  %v508_v60 = vpop.f32.mrf.mxu0 }
 0x12a   : > { %638 = vbcast.lane.b32.xlu1 %v636_v44, 256  ;;  %602 = vbcast.lane.b32.xlu0 %v600_v45, 256  ;;  %v535_v51 = vrot.slane %v527_v49, %v1365_v6  ;;  %v528_v52 = vcombine.high %v527_v49, %v527_v49 }
 0x12c   : > { %v548_v54 = vrot.slane %v535_v51, %v1373_v16  ;;  %v542_v55 = vrot.slane %v528_v52, %v1365_v6  ;;  %v543_v57 = vcombine.high %v535_v51, %v535_v51 }
 0x12e   : > { %645 = vbcast.lane.b32.xlu1 %v643_v46, 256  ;;  %v565_v58 = vmul.f32 %v548_v54, %v505_v53  ;;  %v552_v59 = vrot.slane %v542_v55, %v1373_v16  ;;  %v556_v61 = vrot.slane %v543_v57, %v1373_v16  ;;  %v544_v62 = vcombine.high %v542_v55, %v542_v55 }
 0x12f   : > { %v705_v46 = vsub.s32 %v702_v43, %v1362_v4 }
 0x130   : > { %v566_v63 = vmul.f32 %v552_v59, %v508_v60  ;;  %v570_v1 = vsel %vm569_vm2, %v565_v58, -inf  ;;  %v567_v2 = vmul.f32 %v927_v50, %v556_v61  ;;  %v560_v3 = vrot.slane %v544_v62, %v1373_v16 }
 0x131   : > { %v619_v10 = vsel %vm569_vm2, %v565_v58, 0.0  ;;  %v657_v16 = vrot.slane %v631_v42, %v606_v14 }
 0x132   : > { %652 = vbcast.lane.b32.xlu1 %v650_v47, 256  ;;  %v573_v5 = vsel %vm569_vm2, %v566_v63, -inf  ;;  %v568_v6 = vmul.f32 %v928_v56, %v560_v3  ;;  %v576_v7 = vsel %vm569_vm2, %v567_v2, -inf  ;;  %v622_v11 = vsel %vm569_vm2, %v566_v63, 0.0 }
 0x133   : > { %v625_v12 = vsel %vm569_vm2, %v567_v2, 0.0 }
 0x134   : > { %v579_v8 = vsel %vm569_vm2, %v568_v6, -inf  ;;  %v628_v13 = vsel %vm569_vm2, %v568_v6, 0.0 }
 0x149   : > { %571 = vmax.xlane.f32.xlu0 %v570_v1 }
 0x14d   : > { %574 = vmax.xlane.f32.xlu0 %v573_v5 }
 0x151   : > { %577 = vmax.xlane.f32.xlu0 %v576_v7 }
 0x155   : > { %580 = vmax.xlane.f32.xlu0 %v579_v8 }
 0x156   : > { %620 = vadd.xlane.f32.xlu1 %v619_v10 }
 0x15a   : > { %623 = vadd.xlane.f32.xlu1 %v622_v11 }
 0x15e   : > { %626 = vadd.xlane.f32.xlu1 %v625_v12 }
 0x162   : > { %629 = vadd.xlane.f32.xlu1 %v628_v13 }
 0x16b   : > { %609 = vbcast.lane.b32.xlu0 %v607_v15, 256 }
 0x173   : > { %659 = vbcast.lane.b32.xlu1 %v657_v16, 256 }
 0x198   : > { %v589_v17 = vpop.permute.xlu0 %588  ;;  %v596_v18 = vpop.permute.xlu1 %595 }
 0x19c   : > { %v603_v19 = vpop.permute.xlu0 %602  ;;  %v639_v20 = vpop.permute.xlu1 %638 }
 0x1a0   : > { %v646_v23 = vpop.permute.xlu1 %645 }
 0x1a4   : > { %v653_v25 = vpop.permute.xlu1 %652 }
 0x1d2   : > { %v572_v21 = vpop.xlane.xlu0 %571 }
 0x1d3   : > { %v615_v22 = vmul.f32 %v589_v17, %v572_v21 }
 0x1d5   : > { %678 = vperm.xlu0 %1014, %v615_v22  }
 0x1d6   : > { %v575_v24 = vpop.xlane.xlu0 %574 }
 0x1d7   : > { %v616_v31 = vmul.f32 %v596_v18, %v575_v24 }
 0x1da   : > { %v578_v26 = vpop.xlane.xlu0 %577 }
 0x1db   : > { %v617_v34 = vmul.f32 %v603_v19, %v578_v26 }
 0x1de   : > { %v581_v29 = vpop.xlane.xlu0 %580 }
 0x1df   : > { %v621_v27 = vpop.xlane.xlu1 %620 }
 0x1e0   : > { %v665_v28 = vmul.f32 %v639_v20, %v621_v27 }
 0x1e2   : > { %690 = vperm.xlu1 %1015, %v665_v28   ;;  %v610_v36 = vpop.permute.xlu0 %609 }
 0x1e3   : > { %v624_v30 = vpop.xlane.xlu1 %623  ;;  %v618_v38 = vmul.f32 %v610_v36, %v581_v29 }
 0x1e4   : > { %v666_v32 = vmul.f32 %v646_v23, %v624_v30 }
 0x1e6   : > { %681 = vperm.xlu1 %1015, %v616_v31   ;;  %693 = vperm.xlu0 %1014, %v666_v32  }
 0x1e7   : > { %v627_v33 = vpop.xlane.xlu1 %626 }
 0x1e8   : > { %v667_v35 = vmul.f32 %v653_v25, %v627_v33 }
 0x1ea   : > { %684 = vperm.xlu1 %1015, %v617_v34   ;;  %696 = vperm.xlu0 %1014, %v667_v35  }
 0x1eb   : > { %v630_v37 = vpop.xlane.xlu1 %629 }
 0x1ee   : > { %687 = vperm.xlu1 %1015, %v618_v38  }
 0x1ef   : > { %v660_v39 = vpop.permute.xlu1 %659 }
 0x1f0   : > { %v668_v40 = vmul.f32 %v660_v39, %v630_v37 }
 0x1f2   : > { %699 = vperm.xlu0 %1014, %v668_v40  }
 0x250   : > { %v679_v42 = vpop.permute.xlu0 %678 }
 0x251   : > { %v706_v50 = vrot.slane %v679_v42, %v705_v46 }
 0x25d   : > { %v691_v41 = vpop.permute.xlu1 %690 }
 0x25e   : > { %v722_v56 = vrot.slane %v691_v41, %v705_v46 }
 0x261   : > { %v682_v44 = vpop.permute.xlu1 %681  ;;  %v694_v45 = vpop.permute.xlu0 %693 }
 0x262   : > { %v710_v48 = vrot.slane %v682_v44, %v705_v46  ;;  %v726_v54 = vrot.slane %v694_v45, %v705_v46 }
 0x264   : > { %v736_v53 = vsel %vm735_vm3, %v710_v48, %v706_v50  ;;  %v741_v59 = vsel %vm735_vm3, %v726_v54, %v722_v56 }
 0x265   : > { %v685_v47 = vpop.permute.xlu1 %684  ;;  %v697_v51 = vpop.permute.xlu0 %696 }
 0x266   : > { %v714_v49 = vrot.slane %v685_v47, %v705_v46  ;;  %v730_v4 = vrot.slane %v697_v51, %v705_v46 }
 0x268   : > { %v738_v55 = vsel %vm737_vm4, %v714_v49, %v736_v53  ;;  %v742_v61 = vsel %vm737_vm4, %v730_v4, %v741_v59 }
 0x269   : > { %v688_v52 = vpop.permute.xlu1 %687 }
 0x26a   : > { %v718_v0 = vrot.slane %v688_v52, %v705_v46 }
 0x26c   : > { %v740_v57 = vsel %vm739_vm5, %v718_v0, %v738_v55 }
 0x26d   : > { %747 = vst.msk [vmem:[%s249_s19] sm:$0xf] %vm746_vm6, %v740_v57  ;;  %v700_v58 = vpop.permute.xlu0 %699 }
 0x26e   : > { %v734_v60 = vrot.slane %v700_v58, %v705_v46 }
 0x270   : > { %v743_v62 = vsel %vm739_vm5, %v734_v60, %v742_v61 }
 0x271   : > { %748 = vst.msk [vmem:[%s249_s19 + $0x4] sm:$0xf] %vm746_vm6, %v743_v62 }
 0x272   : > { %1115 = shalt.err (!%p1112_p0)
}
 0x273   : > { %s1116_s22 = scalar_lea.hbm %s1419_s9, 128  ;;  %s1120_s27 = scalar_lea.hbm %s1477_s3, 256 }
 0x274   : > { %p1117_p10 = scmp.ne.s32.totalorder %s1419_s9, %s1116_s22  ;;  %p1121_p7 = scmp.lt.s32.totalorder %s1419_s9, %s1477_s3 }
 0x275   : > { %p1122_p1 = scmp.lt.s32.totalorder %s1120_s27, %s1116_s22 }
 0x276   : > { %p1118_p3 = pnand %p1117_p10, %p1491_p13 }
 0x277   : > { %p1123_p11 = por %p1122_p1, %p1121_p7 }
 0x278   : > { %p1119_p5 = pneg %p1118_p3 }
 0x27a   : > { %p1124_p12 = pnand %p1123_p11, %p1119_p5 }
 0x27c   : > { %1127 = shalt.err (!%p1124_p12)
}
 0x27d   : > { %s1196_s10 = smov 64   ;;  %s1197_s19 = smov 4  }
 0x27e   : > { %938 = dma.vmem_to_hbm [thread:$0]  (%p1491_p13), %s1421_s28, 128, %s1419_s9, %s1428_s15, %s1196_s10, %s1196_s10, %s1197_s19  }
 0x27f PF: > { %s779_s6 = sand.u32 1, %s1166_s12   ;;  %p1492_p2 = scmp.ne.s32.totalorder %s1484_s21, 0 }
 0x280   : > { %p1493_p9 = scmp.ge.s32.totalorder %s1186_s17, 2  ;;  %s780_s7 = scalar_lea.sflag [#allocation4], %s779_s6 }
 0x282   : > { %p952_p8 = pnand %p1493_p9, %p1492_p2 }
 0x284   : > { %p953_p4 = pneg %p952_p8 }
 0x286   : > { %1161 = dma.done.wait (%p953_p4), %s780_s7, 128  }
 0x287   : > { %1163 = vsyncadd (%p953_p4), %s780_s7, 4294967168  ;;  %s20_s17 = sadd.s32 1, %s1186_s17   ;;  %s1494_s12 = smov %s1170_s13 }
 0x288   : > { %p17_p6 = scmp.ge.s32.totalorder %s20_s17, 4   ;;  %s1495_s13 = smov %s1174_s14 }
 0x289   : > { %s1496_s14 = smov %s1266_s24  ;;  %s1497_s15 = smov %s1182_s16 }
 0x28a   : > { %s1498_s16 = smov %s1500_s18  ;;  %19 = sbr.rel (!%p17_p6) target bundleno = 7 (0x7), region = 93 }
 0x28f   :  { %785 = vsyncpa [#allocation3], 1 }
 0x290   :  { %787 = vsyncpa [#allocation3 + $0x1], 1 }
 0x291   :  { %788 = vsyncpa [#allocation6], 1 }
 0x292   :  { %790 = vsyncpa [#allocation6 + $0x1], 1 }
 0x293   :  { %791 = vsyncpa [#allocation4], 1 }
 0x294   :  { %793 = vsyncpa [#allocation4 + $0x1], 1 }

</bundles_post_ra>
